<compile_context>
chip_gen: v7x
topology: tpu7x:2x2x1
jax: 0.10.0
libtpu: 0.0.40
codegen_flags: <defaults>
</compile_context>

<pallas_src>
import functools

import jax
import jax.numpy as jnp
import numpy as np
from jax.experimental import pallas as pl
from jax.experimental.pallas import tpu as pltpu


# ----------------------------------------------------------------------------
# Fused two-layer RGCN kernel. Everything is VMEM-resident (grid=(1,)).
#   adjX_ref : [Np, B*Np]      relation-combined adjacency, column order b*Np + j (bf16)
#   x_ref    : [Np, Dp]        padded node features (bf16)
#   wX_ref   : [Dp, (1+B)*Dp]  = concat([root, bases_0, ..., bases_{B-1}], axis=1) (bf16)
#   biasX_ref: [1, Dp]         (f32)
#   o_ref    : [Np, Dp]        (f32)
# ----------------------------------------------------------------------------
def fused_rgcn_kernel(adj1_ref, adj2_ref, x_ref,
                      w1_ref, bias1_ref, w2_ref, bias2_ref,
                      o_ref, *, num_bases, dp):

    def layer(x_bf16, adj_ref, w_ref, bias_ref):
        # One wide bf16 MXU matmul covers the root transform and every basis
        # transform; accumulation stays f32.
        t = jnp.dot(x_bf16, w_ref[...],
                    preferred_element_type=jnp.float32)      # [Np, (1+B)*Dp] f32
        out = t[:, :dp] + bias_ref[...]                        # root + bias (f32 VPU)
        # Stack the basis transforms along the contraction (sublane) axis so the
        # relation-combined aggregation is a SINGLE MXU matmul with K = B*Np.
        tb = jnp.concatenate(
            [t[:, (1 + b) * dp:(2 + b) * dp] for b in range(num_bases)],
            axis=0).astype(jnp.bfloat16)                       # [B*Np, Dp] bf16
        out = out + jnp.dot(adj_ref[...], tb,
                            preferred_element_type=jnp.float32)
        return out

    x = x_ref[...]                                             # bf16
    h = jnp.maximum(layer(x, adj1_ref, w1_ref, bias1_ref), 0.0)   # conv1 + ReLU (f32)
    # F.dropout: eval-mode semantics (identity).
    # TODO(synk): training-mode dropout would need pltpu.prng_* masking.
    out = layer(h.astype(jnp.bfloat16), adj2_ref, w2_ref, bias2_ref)  # conv2
    o_ref[...] = out.astype(o_ref.dtype)


def rgcn_fused(x_p, adj1_cat, adj2_cat, w1, bias1, w2, bias2):
    """Fused 2-layer RGCN via one pallas_call.
    x_p:[Np,Dp] bf16, adjX_cat:[Np,B*Np] bf16, wX:[Dp,(1+B)*Dp] bf16, biasX:[1,Dp] f32."""
    Np, Dp = x_p.shape
    B = adj1_cat.shape[1] // Np

    kernel = functools.partial(fused_rgcn_kernel, num_bases=B, dp=Dp)

    return pl.pallas_call(
        kernel,
        out_shape=jax.ShapeDtypeStruct((Np, Dp), jnp.float32),
        grid_spec=pltpu.PrefetchScalarGridSpec(
            num_scalar_prefetch=0,
            grid=(1,),
            in_specs=[
                pl.BlockSpec((Np, B * Np), lambda i: (0, 0)),       # adj1 (combined)
                pl.BlockSpec((Np, B * Np), lambda i: (0, 0)),       # adj2 (combined)
                pl.BlockSpec((Np, Dp), lambda i: (0, 0)),           # x
                pl.BlockSpec((Dp, w1.shape[1]), lambda i: (0, 0)),  # [root1|bases1]
                pl.BlockSpec((1, Dp), lambda i: (0, 0)),            # bias1
                pl.BlockSpec((Dp, w2.shape[1]), lambda i: (0, 0)),  # [root2|bases2]
                pl.BlockSpec((1, Dp), lambda i: (0, 0)),            # bias2
            ],
            out_specs=pl.BlockSpec((Np, Dp), lambda i: (0, 0)),
        ),
        compiler_params=pltpu.CompilerParams(dimension_semantics=("arbitrary",)),
    )(adj1_cat, adj2_cat, x_p, w1, bias1, w2, bias2)


# ----------------------------------------------------------------------------
# Glue: parameter init, embedding lookup, dense adjacency, padding / combination.
# ----------------------------------------------------------------------------
def xavier_uniform(key, shape, gain=1.0):
    fan_in, fan_out = shape[-2], shape[-1]
    a = gain * np.sqrt(6.0 / (fan_in + fan_out))
    return jax.random.uniform(key, shape, jnp.float32, -a, a)


def init_conv_params(key, dim, num_rel, num_bases):
    k1, k2, k3 = jax.random.split(key, 3)
    bases = xavier_uniform(k1, (num_bases, dim, dim))
    comp = xavier_uniform(k2, (num_rel, num_bases))
    root = xavier_uniform(k3, (dim, dim))
    bias = jnp.zeros((dim,), jnp.float32)
    return bases, comp, root, bias


def build_adjacency(edge_index, edge_type, num_rel, num_nodes_pad):
    """Dense per-relation adjacency, rows normalized (mean aggregation), built at
    the padded node count so the kernel sees lane-dense tiles."""
    src, dst = edge_index[0], edge_index[1]
    adj = jnp.zeros((num_rel, num_nodes_pad, num_nodes_pad), jnp.float32)
    adj = adj.at[edge_type, dst, src].add(1.0)
    deg = jnp.sum(adj, axis=2, keepdims=True)
    adj = adj / jnp.maximum(deg, 1.0)
    return adj


def combine_adjacency(adj_pad, comp, mxu_dtype):
    """Precombine relations into B adjacency slabs (review item 1) and lay them out
    as [Np, B*Np] (column order b*Np + j) so the kernel's aggregation is a single
    K=B*Np MXU matmul (review item 2)."""
    _, Np, _ = adj_pad.shape
    B = comp.shape[1]
    adj_cat = jnp.einsum("rb,rij->ibj", comp, adj_pad).reshape(Np, B * Np)
    return adj_cat.astype(mxu_dtype)


def prep_layer_weights(bases, root, bias, dp, mxu_dtype):
    """Zero-pad to Dp and concat [root | bases_0 | ... ] along the output dim."""
    B, D, _ = bases.shape
    bases_p = jnp.pad(bases, ((0, 0), (0, dp - D), (0, dp - D)))
    root_p = jnp.pad(root, ((0, dp - D), (0, dp - D)))
    bias_p = jnp.pad(bias, (0, dp - D)).reshape(1, dp)
    wcat = jnp.concatenate([root_p] + [bases_p[b] for b in range(B)], axis=1)
    return wcat.astype(mxu_dtype), bias_p


def rgcn_forward(entity, edge_index, edge_type, params, dp=128,
                 mxu_dtype=jnp.bfloat16):
    (emb_table, bases1, comp1, root1, bias1, bases2, comp2, root2, bias2) = params
    num_rel = comp1.shape[0]
    x = jnp.take(emb_table, entity, axis=0)                 # embedding lookup
    N, D = x.shape
    Np = max(128, ((N + 127) // 128) * 128)                 # lane-dense node dim

    adj = build_adjacency(edge_index, edge_type, num_rel, Np)
    adj1_cat = combine_adjacency(adj, comp1, mxu_dtype)
    adj2_cat = combine_adjacency(adj, comp2, mxu_dtype)

    x_p = jnp.pad(x, ((0, Np - N), (0, dp - D))).astype(mxu_dtype)
    w1, b1 = prep_layer_weights(bases1, root1, bias1, dp, mxu_dtype)
    w2, b2 = prep_layer_weights(bases2, root2, bias2, dp, mxu_dtype)

    out = rgcn_fused(x_p, adj1_cat, adj2_cat, w1, b1, w2, b2)
    return out[:N, :D]


def rgcn_reference(entity, edge_index, edge_type, params):
    """Pure-JAX f32 reference of the same math (sanity check)."""
    (emb_table, bases1, comp1, root1, bias1, bases2, comp2, root2, bias2) = params
    num_rel = comp1.shape[0]
    x = jnp.take(emb_table, entity, axis=0)
    N = x.shape[0]
    adj = build_adjacency(edge_index, edge_type, num_rel, N)

    def layer(x, comp, bases, root, bias):
        w = jnp.einsum("rb,bio->rio", comp, bases)
        msg = jnp.einsum("nd,rdo->rno", x, w)
        agg = jnp.einsum("rij,rjo->io", adj, msg)
        return x @ root + bias[None, :] + agg

    h = jnp.maximum(layer(x, comp1, bases1, root1, bias1), 0.0)
    return layer(h, comp2, bases2, root2, bias2)


if __name__ == "__main__":
    # Small, module-consistent sizes.
    num_entities, num_relations, num_bases, dropout, dim = 32, 4, 2, 0.2, 32
    num_rel_conv = num_relations * 2          # RGCN uses num_relations * 2 in conv
    num_nodes, num_edges = 32, 64

    key = jax.random.PRNGKey(0)
    k_emb, k_rel, k_c1, k_c2, k_ei, k_et = jax.random.split(key, 6)

    emb_table = jax.random.normal(k_emb, (num_entities, dim), jnp.float32)
    # relation_embedding exists in the module but is unused in forward().
    relation_embedding = xavier_uniform(k_rel, (num_relations, dim),
                                        gain=np.sqrt(2.0))
    bases1, comp1, root1, bias1 = init_conv_params(k_c1, dim, num_rel_conv, num_bases)
    bases2, comp2, root2, bias2 = init_conv_params(k_c2, dim, num_rel_conv, num_bases)
    params = (emb_table, bases1, comp1, root1, bias1, bases2, comp2, root2, bias2)

    entity = jnp.arange(num_nodes, dtype=jnp.int32)
    edge_index = jax.random.randint(k_ei, (2, num_edges), 0, num_nodes, jnp.int32)
    edge_type = jax.random.randint(k_et, (num_edges,), 0, num_rel_conv, jnp.int32)

    out = rgcn_forward(entity, edge_index, edge_type, params)
    out = jax.block_until_ready(out)

    ref = jax.block_until_ready(
        rgcn_reference(entity, edge_index, edge_type, params))
    # bf16 MXU inputs with f32 accumulation over two layers -> loosened tolerance.
    np.testing.assert_allclose(np.asarray(out), np.asarray(ref),
                               rtol=5e-2, atol=5e-2)

    print("KERNEL_OK")
</pallas_src>

<mosaic_0001>
module attributes {stable_mosaic.version = 11 : i64} {
  func.func @fused_rgcn_kernel(%arg0: i32, %arg1: memref<128x256xbf16, #tpu.memory_space<vmem>>, %arg2: memref<128x256xbf16, #tpu.memory_space<vmem>>, %arg3: memref<128x128xbf16, #tpu.memory_space<vmem>>, %arg4: memref<128x384xbf16, #tpu.memory_space<vmem>>, %arg5: memref<1x128xf32, #tpu.memory_space<vmem>>, %arg6: memref<128x384xbf16, #tpu.memory_space<vmem>>, %arg7: memref<1x128xf32, #tpu.memory_space<vmem>>, %arg8: memref<128x128xf32, #tpu.memory_space<vmem>>) attributes {dimension_semantics = [#tpu.dimension_semantics<arbitrary>], iteration_bounds = array<i64: 1>, scalar_prefetch = 0 : i64, scratch_operands = 0 : i64, tpu.core_type = #tpu.core_type<tc>, window_params = [{pipeline_mode = #tpu.pipeline_mode<synchronous>, transform_indices = @transform_0, window_bounds = array<i64: 128, 256>}, {pipeline_mode = #tpu.pipeline_mode<synchronous>, transform_indices = @transform_1, window_bounds = array<i64: 128, 256>}, {pipeline_mode = #tpu.pipeline_mode<synchronous>, transform_indices = @transform_2, window_bounds = array<i64: 128, 128>}, {pipeline_mode = #tpu.pipeline_mode<synchronous>, transform_indices = @transform_3, window_bounds = array<i64: 128, 384>}, {pipeline_mode = #tpu.pipeline_mode<synchronous>, transform_indices = @transform_4, window_bounds = array<i64: 1, 128>}, {pipeline_mode = #tpu.pipeline_mode<synchronous>, transform_indices = @transform_5, window_bounds = array<i64: 128, 384>}, {pipeline_mode = #tpu.pipeline_mode<synchronous>, transform_indices = @transform_6, window_bounds = array<i64: 1, 128>}, {pipeline_mode = #tpu.pipeline_mode<synchronous>, transform_indices = @transform_7, window_bounds = array<i64: 128, 128>}]} {
    %c0 = arith.constant 0 : index
    %c0_0 = arith.constant 0 : index
    %0 = vector.load %arg3[%c0, %c0_0] : memref<128x128xbf16, #tpu.memory_space<vmem>>, vector<128x128xbf16>
    %c0_1 = arith.constant 0 : index
    %c0_2 = arith.constant 0 : index
    %1 = vector.load %arg4[%c0_1, %c0_2] : memref<128x384xbf16, #tpu.memory_space<vmem>>, vector<128x384xbf16>
    %cst = arith.constant dense<0.000000e+00> : vector<128x384xf32>
    %2 = tpu.matmul %0, %1, %cst {dimension_numbers = #tpu.dot_dimension_numbers<[1], [0], [0], [1], [0, 0, 1, 1], [], []>} : vector<128x128xbf16>, vector<128x384xbf16>, vector<128x384xf32> -> vector<128x384xf32>
    %3 = vector.extract_strided_slice %2 {offsets = [0, 0], sizes = [128, 128], strides = [1, 1]} : vector<128x384xf32> to vector<128x128xf32>
    %c0_3 = arith.constant 0 : index
    %c0_4 = arith.constant 0 : index
    %4 = vector.load %arg5[%c0_3, %c0_4] : memref<1x128xf32, #tpu.memory_space<vmem>>, vector<1x128xf32>
    %5 = vector.broadcast %4 : vector<1x128xf32> to vector<128x128xf32>
    %6 = arith.addf %3, %5 : vector<128x128xf32>
    %7 = vector.extract_strided_slice %2 {offsets = [0, 128], sizes = [128, 128], strides = [1, 1]} : vector<128x384xf32> to vector<128x128xf32>
    %8 = vector.extract_strided_slice %2 {offsets = [0, 256], sizes = [128, 128], strides = [1, 1]} : vector<128x384xf32> to vector<128x128xf32>
    %9 = tpu.concatenate %7, %8 in 0 : vector<128x128xf32>, vector<128x128xf32> -> vector<256x128xf32>
    %10 = arith.truncf %9 : vector<256x128xf32> to vector<256x128xbf16>
    %c0_5 = arith.constant 0 : index
    %c0_6 = arith.constant 0 : index
    %11 = vector.load %arg1[%c0_5, %c0_6] : memref<128x256xbf16, #tpu.memory_space<vmem>>, vector<128x256xbf16>
    %cst_7 = arith.constant dense<0.000000e+00> : vector<128x128xf32>
    %12 = tpu.matmul %11, %10, %cst_7 {dimension_numbers = #tpu.dot_dimension_numbers<[1], [0], [0], [1], [0, 0, 1, 1], [], []>} : vector<128x256xbf16>, vector<256x128xbf16>, vector<128x128xf32> -> vector<128x128xf32>
    %13 = arith.addf %6, %12 : vector<128x128xf32>
    %cst_8 = arith.constant 0.000000e+00 : f32
    %14 = vector.broadcast %cst_8 : f32 to vector<128x128xf32>
    %15 = arith.maximumf %13, %14 : vector<128x128xf32>
    %16 = arith.truncf %15 : vector<128x128xf32> to vector<128x128xbf16>
    %c0_9 = arith.constant 0 : index
    %c0_10 = arith.constant 0 : index
    %17 = vector.load %arg6[%c0_9, %c0_10] : memref<128x384xbf16, #tpu.memory_space<vmem>>, vector<128x384xbf16>
    %cst_11 = arith.constant dense<0.000000e+00> : vector<128x384xf32>
    %18 = tpu.matmul %16, %17, %cst_11 {dimension_numbers = #tpu.dot_dimension_numbers<[1], [0], [0], [1], [0, 0, 1, 1], [], []>} : vector<128x128xbf16>, vector<128x384xbf16>, vector<128x384xf32> -> vector<128x384xf32>
    %19 = vector.extract_strided_slice %18 {offsets = [0, 0], sizes = [128, 128], strides = [1, 1]} : vector<128x384xf32> to vector<128x128xf32>
    %c0_12 = arith.constant 0 : index
    %c0_13 = arith.constant 0 : index
    %20 = vector.load %arg7[%c0_12, %c0_13] : memref<1x128xf32, #tpu.memory_space<vmem>>, vector<1x128xf32>
    %21 = vector.broadcast %20 : vector<1x128xf32> to vector<128x128xf32>
    %22 = arith.addf %19, %21 : vector<128x128xf32>
    %23 = vector.extract_strided_slice %18 {offsets = [0, 128], sizes = [128, 128], strides = [1, 1]} : vector<128x384xf32> to vector<128x128xf32>
    %24 = vector.extract_strided_slice %18 {offsets = [0, 256], sizes = [128, 128], strides = [1, 1]} : vector<128x384xf32> to vector<128x128xf32>
    %25 = tpu.concatenate %23, %24 in 0 : vector<128x128xf32>, vector<128x128xf32> -> vector<256x128xf32>
    %26 = arith.truncf %25 : vector<256x128xf32> to vector<256x128xbf16>
    %c0_14 = arith.constant 0 : index
    %c0_15 = arith.constant 0 : index
    %27 = vector.load %arg2[%c0_14, %c0_15] : memref<128x256xbf16, #tpu.memory_space<vmem>>, vector<128x256xbf16>
    %cst_16 = arith.constant dense<0.000000e+00> : vector<128x128xf32>
    %28 = tpu.matmul %27, %26, %cst_16 {dimension_numbers = #tpu.dot_dimension_numbers<[1], [0], [0], [1], [0, 0, 1, 1], [], []>} : vector<128x256xbf16>, vector<256x128xbf16>, vector<128x128xf32> -> vector<128x128xf32>
    %29 = arith.addf %22, %28 : vector<128x128xf32>
    %c0_17 = arith.constant 0 : index
    %c0_18 = arith.constant 0 : index
    %30 = vector.load %arg8[%c0_17, %c0_18] : memref<128x128xf32, #tpu.memory_space<vmem>>, vector<128x128xf32>
    tpu.vector_store %arg8[%c0_17, %c0_18], %29 {strides = array<i32>} : memref<128x128xf32, #tpu.memory_space<vmem>>, vector<128x128xf32>,
    return
  }
  func.func @transform_0(%arg0: i32) -> (i32, i32) {
    %c0_i32 = arith.constant 0 : i32
    %c0_i32_0 = arith.constant 0 : i32
    %c0_i32_1 = arith.constant 0 : i32
    return %c0_i32, %c0_i32_0 : i32, i32
  }
  func.func @transform_1(%arg0: i32) -> (i32, i32) {
    %c0_i32 = arith.constant 0 : i32
    %c0_i32_0 = arith.constant 0 : i32
    %c0_i32_1 = arith.constant 0 : i32
    return %c0_i32, %c0_i32_0 : i32, i32
  }
  func.func @transform_2(%arg0: i32) -> (i32, i32) {
    %c0_i32 = arith.constant 0 : i32
    %c0_i32_0 = arith.constant 0 : i32
    %c0_i32_1 = arith.constant 0 : i32
    return %c0_i32, %c0_i32_0 : i32, i32
  }
  func.func @transform_3(%arg0: i32) -> (i32, i32) {
    %c0_i32 = arith.constant 0 : i32
    %c0_i32_0 = arith.constant 0 : i32
    %c0_i32_1 = arith.constant 0 : i32
    return %c0_i32, %c0_i32_0 : i32, i32
  }
  func.func @transform_4(%arg0: i32) -> (i32, i32) {
    %c0_i32 = arith.constant 0 : i32
    %c0_i32_0 = arith.constant 0 : i32
    %c0_i32_1 = arith.constant 0 : i32
    return %c0_i32, %c0_i32_0 : i32, i32
  }
  func.func @transform_5(%arg0: i32) -> (i32, i32) {
    %c0_i32 = arith.constant 0 : i32
    %c0_i32_0 = arith.constant 0 : i32
    %c0_i32_1 = arith.constant 0 : i32
    return %c0_i32, %c0_i32_0 : i32, i32
  }
  func.func @transform_6(%arg0: i32) -> (i32, i32) {
    %c0_i32 = arith.constant 0 : i32
    %c0_i32_0 = arith.constant 0 : i32
    %c0_i32_1 = arith.constant 0 : i32
    return %c0_i32, %c0_i32_0 : i32, i32
  }
  func.func @transform_7(%arg0: i32) -> (i32, i32) {
    %c0_i32 = arith.constant 0 : i32
    %c0_i32_0 = arith.constant 0 : i32
    %c0_i32_1 = arith.constant 0 : i32
    return %c0_i32, %c0_i32_0 : i32, i32
  }
}

</mosaic_0001>

<bundles_post_ra>
// kernel: tpu_custom_call.1
= control target key start
LH: loop header
LB: loop body
LE: loop exit
PB: predicated region body
PF: predicated region fallthrough
CT: control target
= control target key end

     0   :  { %12 = vsyncpa [#allocation3], 0  ;;  %s2378_s0 = inlined_call_operand.hbm [shape: bf16[128,256], index: 0, kind: input, shape index: {}]   ;;  %s2379_s1 = inlined_call_operand.hbm [shape: bf16[128,256], index: 1, kind: input, shape index: {}]   ;;  %s2380_s2 = inlined_call_operand.hbm [shape: bf16[128,128], index: 2, kind: input, shape index: {}]   ;;  %s2381_s3 = inlined_call_operand.hbm [shape: bf16[128,384], index: 3, kind: input, shape index: {}]   ;;  %s2382_s4 = inlined_call_operand.vmem [shape: f32[1,128], index: 4, kind: input, shape index: {}]   ;;  %s2383_s5 = inlined_call_operand.hbm [shape: bf16[128,384], index: 5, kind: input, shape index: {}]   ;;  %s2384_s6 = inlined_call_operand.vmem [shape: f32[1,128], index: 6, kind: input, shape index: {}]   ;;  %s2385_s7 = inlined_call_operand.hbm [shape: f32[128,128], index: 7, kind: output, shape index: {}]  }
   0x1   :  { %13 = vsyncpa [#allocation6], 0 }
   0x2   :  { %14 = vsyncpa [#allocation9], 0 }
   0x3   :  { %15 = vsyncpa [#allocation4], 0  ;;  %s2058_s24 = smov [#allocation5]   ;;  %s2059_s26 = smov [#allocation8]  }
   0x4   :  { %s33_s25 = sshll.u32 %s2058_s24, 4  ;;  %s57_s27 = sshll.u32 %s2059_s26, 4  ;;  %s34_s25 = int_to_ptr.vmem [resolvable:$true] %s33_s25  ;;  %s2111_s27 = int_to_ptr.vmem [resolvable:$true] %s57_s27 }
   0x5   :  { %s1918_s30 = scalar_lea.hbm %s2379_s1, 2048 }
   0x6   :  { %p1919_p0 = scmp.ne.s32.totalorder %s2379_s1, %s1918_s30  ;;  %p1922_p1 = scmp.lt.u32.totalorder %s1918_s30, %s2379_s1 }
   0x8   :  { %p1924_p2 = pnand %p1922_p1, %p1919_p0 }
   0xa   :  { %1927 = shalt.err (!%p1924_p2)
}
   0xb   :  { %s1928_s12 = scalar_lea.vmem %s34_s25, 2048  ;;  %p1933_p4 = scmp.lt.s32.totalorder %s34_s25, %s34_s25 }
   0xc   :  { %p1929_p3 = scmp.ne.s32.totalorder %s34_s25, %s1928_s12  ;;  %p1934_p5 = scmp.lt.s32.totalorder %s1928_s12, %s1928_s12 }
   0xe   :  { %p1935_p6 = por %p1934_p5, %p1933_p4 }
  0x10   :  { %p1936_p7 = pnand %p1935_p6, %p1929_p3 }
  0x12   :  { %1939 = shalt.err (!%p1936_p7)
}
  0x13   :  { %s2060_s13 = smov 128   ;;  %s2061_s14 = smov 8  }
  0x14   :  { %39 = dma.hbm_to_vmem [thread:$0]  %s2379_s1, 2048, %s34_s25, [#allocation6], %s2060_s13, %s2060_s13, %s2061_s14  }
  0x15   :  { %s1940_s19 = scalar_lea.hbm %s2381_s3, 3072 }
  0x16   :  { %p1941_p8 = scmp.ne.s32.totalorder %s2381_s3, %s1940_s19  ;;  %p1944_p9 = scmp.lt.u32.totalorder %s1940_s19, %s2381_s3 }
  0x18   :  { %p1946_p10 = pnand %p1944_p9, %p1941_p8 }
  0x1a   :  { %1949 = shalt.err (!%p1946_p10)
}
  0x1b   :  { %s1950_s24 = scalar_lea.vmem %s2111_s27, 3072  ;;  %p1955_p12 = scmp.lt.s32.totalorder %s2111_s27, %s2111_s27 }
  0x1c   :  { %p1951_p11 = scmp.ne.s32.totalorder %s2111_s27, %s1950_s24  ;;  %p1956_p13 = scmp.lt.s32.totalorder %s1950_s24, %s1950_s24 }
  0x1e   :  { %p1957_p0 = por %p1956_p13, %p1955_p12 }
  0x20   :  { %p1958_p1 = pnand %p1957_p0, %p1951_p11 }
  0x22   :  { %1961 = shalt.err (!%p1958_p1)
}
  0x23   :  { %s2062_s1 = smov 192   ;;  %s2063_s25 = smov 12  }
  0x24   :  { %63 = dma.hbm_to_vmem [thread:$0]  %s2381_s3, 3072, %s2111_s27, [#allocation9], %s2062_s1, %s2062_s1, %s2063_s25  }
  0x25   :  { %s2064_s29 = smov [#allocation2]   ;;  %s2065_s8 = smov [#allocation7]  }
  0x26   :  { %s21_s30 = sshll.u32 %s2064_s29, 4  ;;  %s45_s9 = sshll.u32 %s2065_s8, 4  ;;  %s22_s30 = int_to_ptr.vmem [resolvable:$true] %s21_s30  ;;  %s2148_s9 = int_to_ptr.vmem [resolvable:$true] %s45_s9 }
  0x27   :  { %s1962_s12 = scalar_lea.hbm %s2378_s0, 2048 }
  0x28   :  { %p1963_p2 = scmp.ne.s32.totalorder %s2378_s0, %s1962_s12  ;;  %p1966_p3 = scmp.lt.u32.totalorder %s1962_s12, %s2378_s0 }
  0x2a   :  { %p1968_p4 = pnand %p1966_p3, %p1963_p2 }
  0x2c   :  { %1971 = shalt.err (!%p1968_p4)
}
  0x2d   :  { %s1972_s3 = scalar_lea.vmem %s22_s30, 2048  ;;  %p1977_p6 = scmp.lt.s32.totalorder %s22_s30, %s22_s30 }
  0x2e   :  { %p1973_p5 = scmp.ne.s32.totalorder %s22_s30, %s1972_s3  ;;  %p1978_p7 = scmp.lt.s32.totalorder %s1972_s3, %s1972_s3 }
  0x30   :  { %p1979_p8 = por %p1978_p7, %p1977_p6 }
  0x32   :  { %p1980_p9 = pnand %p1979_p8, %p1973_p5 }
  0x34   :  { %1983 = shalt.err (!%p1980_p9)
}
  0x35   :  { %27 = dma.hbm_to_vmem [thread:$0]  %s2378_s0, 2048, %s22_s30, [#allocation3], %s2060_s13, %s2060_s13, %s2061_s14  }
  0x36   :  { %s1984_s22 = scalar_lea.hbm %s2380_s2, 1024 }
  0x37   :  { %p1985_p10 = scmp.ne.s32.totalorder %s2380_s2, %s1984_s22  ;;  %p1988_p11 = scmp.lt.u32.totalorder %s1984_s22, %s2380_s2 }
  0x39   :  { %p1990_p12 = pnand %p1988_p11, %p1985_p10 }
  0x3b   :  { %1993 = shalt.err (!%p1990_p12)
}
  0x3c   :  { %s1994_s29 = scalar_lea.vmem %s2148_s9, 1024  ;;  %p1999_p0 = scmp.lt.s32.totalorder %s2148_s9, %s2148_s9 }
  0x3d   :  { %p1995_p13 = scmp.ne.s32.totalorder %s2148_s9, %s1994_s29  ;;  %p2000_p1 = scmp.lt.s32.totalorder %s1994_s29, %s1994_s29 }
  0x3f   :  { %p2001_p2 = por %p2000_p1, %p1999_p0 }
  0x41   :  { %p2002_p3 = pnand %p2001_p2, %p1995_p13 }
  0x43   :  { %2005 = shalt.err (!%p2002_p3)
}
  0x44   :  { %s2066_s0 = smov 64   ;;  %s2067_s30 = smov 4  }
  0x45   :  { %51 = dma.hbm_to_vmem [thread:$0]  %s2380_s2, 1024, %s2148_s9, [#allocation6], %s2066_s0, %s2066_s0, %s2067_s30  }
  0x46   :  { %s2068_s11 = smov [#allocation10]   ;;  %s2006_s17 = scalar_lea.hbm %s2383_s5, 3072 }
  0x47   :  { %s71_s12 = sshll.u32 %s2068_s11, 4  ;;  %p2007_p4 = scmp.ne.s32.totalorder %s2383_s5, %s2006_s17  ;;  %s72_s12 = int_to_ptr.vmem [resolvable:$true] %s71_s12 }
  0x48   :  { %p2010_p5 = scmp.lt.u32.totalorder %s2006_s17, %s2383_s5 }
  0x4a   :  { %p2012_p6 = pnand %p2010_p5, %p2007_p4 }
  0x4c   :  { %2015 = shalt.err (!%p2012_p6)
}
  0x4d   :  { %s2016_s20 = scalar_lea.vmem %s72_s12, 3072  ;;  %p2021_p8 = scmp.lt.s32.totalorder %s72_s12, %s72_s12 }
  0x4e   :  { %p2017_p7 = scmp.ne.s32.totalorder %s72_s12, %s2016_s20  ;;  %p2022_p9 = scmp.lt.s32.totalorder %s2016_s20, %s2016_s20 }
  0x50   :  { %p2023_p10 = por %p2022_p9, %p2021_p8 }
  0x52   :  { %p2024_p11 = pnand %p2023_p10, %p2017_p7 }
  0x54   :  { %2027 = shalt.err (!%p2024_p11)
}
  0x55   :  { %77 = dma.hbm_to_vmem [thread:$0]  %s2383_s5, 3072, %s72_s12, [#allocation9], %s2062_s1, %s2062_s1, %s2063_s25  }
  0x56   :  { %2050 = dma.done.wait [#allocation3], 2048  }
  0x57   :  { %2051 = vsyncadd [#allocation3], 4294965248 }
  0x58   :  { %2052 = dma.done.wait [#allocation6], 3072  }
  0x59   :  { %2053 = vsyncadd [#allocation6], 4294964224 }
  0x5a   :  { %2054 = dma.done.wait [#allocation9], 6144  }
  0x5b   :  { %2055 = vsyncadd [#allocation9], 4294961152  ;;  %v2069_v0 = vmov 0   ;;  %v1798_v1 = vld [vmem:[#allocation8 + $0x4] ss:$12 sps:$4 sm:$0xff]   ;;  %v1825_v22 = vld [vmem:[#allocation7 + $0x28] sm:$0xff]  }
  0x5c   :  { %392 = vmatprep.mubr.bf16.mxu1 %v2069_v0  ;;  %352 = vmatprep.mubr.bf16.mxu0 %v2069_v0  ;;  %v1800_v2 = vld [vmem:[#allocation8] ss:$12 sps:$4 sm:$0xff]   ;;  %v1801_v3 = vld [vmem:[#allocation8 + $0x1c] ss:$12 sps:$4 sm:$0xff]   ;;  %v1803_v4 = vld [vmem:[#allocation8 + $0x18] ss:$12 sps:$4 sm:$0xff]  }
  0x5d   :  { %1769 = vmatprep.subr.bf16.mxu1 %v1798_v1  ;;  %320 = vmatprep.subr.bf16.mxu0 %v1798_v1  ;;  %v1804_v5 = vld [vmem:[#allocation8 + $0x34] ss:$12 sps:$4 sm:$0xff]   ;;  %v1806_v6 = vld [vmem:[#allocation8 + $0x30] ss:$12 sps:$4 sm:$0xff]   ;;  %v1807_v7 = vld [vmem:[#allocation8 + $0x4c] ss:$12 sps:$4 sm:$0xff]  }
  0x5e   :  { %1777 = vmatpush1.bf16.msra.mxu1 %v1800_v2  ;;  %321 = vmatpush1.bf16.msra.mxu0 %v1800_v2  ;;  %v1809_v8 = vld [vmem:[#allocation8 + $0x48] ss:$12 sps:$4 sm:$0xff]   ;;  %v1810_v9 = vld [vmem:[#allocation8 + $0x64] ss:$12 sps:$4 sm:$0xff]   ;;  %v1812_v10 = vld [vmem:[#allocation8 + $0x60] ss:$12 sps:$4 sm:$0xff]  }
  0x5f   :  { %1770 = vmatprep.subr.bf16.mxu1 %v1801_v3  ;;  %322 = vmatprep.subr.bf16.mxu0 %v1801_v3  ;;  %v1813_v11 = vld [vmem:[#allocation8 + $0x7c] ss:$12 sps:$4 sm:$0xff]   ;;  %v1815_v12 = vld [vmem:[#allocation8 + $0x78] ss:$12 sps:$4 sm:$0xff]   ;;  %v1816_v13 = vld [vmem:[#allocation8 + $0x94] ss:$12 sps:$4 sm:$0xff]  }
  0x60   :  { %v1818_v14 = vld [vmem:[#allocation8 + $0x90] ss:$12 sps:$4 sm:$0xff]   ;;  %v1819_v15 = vld [vmem:[#allocation8 + $0xac] ss:$12 sps:$4 sm:$0xff]   ;;  %v1821_v16 = vld [vmem:[#allocation8 + $0xa8] ss:$12 sps:$4 sm:$0xff]  }
  0x61   :  { %v1823_v17 = vld [vmem:[#allocation8 + $0x8] ss:$12 sps:$4 sm:$0xff]   ;;  %v1822_v18 = vld [vmem:[#allocation7 + $0x20] sm:$0xff]   ;;  %v1827_v24 = vld [vmem:[#allocation8 + $0x50] ss:$12 sps:$4 sm:$0xff]  }
  0x62   :  { %1778 = vmatpush1.bf16.msra.mxu1 %v1803_v4  ;;  %323 = vmatpush1.bf16.msra.mxu0 %v1803_v4  ;;  %v1830_v19 = vld [vmem:[#allocation7] sm:$0xff]   ;;  %v1834_v23 = vld [vmem:[#allocation7 + $0x8] sm:$0xff]   ;;  %v1828_v26 = vld [vmem:[#allocation7 + $0x30] sm:$0xff]  }
  0x63   :  { %1771 = vmatprep.subr.bf16.mxu1 %v1804_v5  ;;  %324 = vmatprep.subr.bf16.mxu0 %v1804_v5  ;;  %v1824_v20 = vld [vmem:[#allocation8 + $0x20] ss:$12 sps:$4 sm:$0xff]   ;;  %v1826_v21 = vld [vmem:[#allocation8 + $0x38] ss:$12 sps:$4 sm:$0xff]   ;;  %v1829_v25 = vld [vmem:[#allocation8 + $0x68] ss:$12 sps:$4 sm:$0xff]  }
  0x64   :  { %v1836_v27 = vld [vmem:[#allocation7 + $0x10] sm:$0xff]   ;;  %v1831_v28 = vld [vmem:[#allocation8 + $0x80] ss:$12 sps:$4 sm:$0xff]   ;;  %v1833_v29 = vld [vmem:[#allocation8 + $0x98] ss:$12 sps:$4 sm:$0xff]  }
  0x65   :  { %v1832_v30 = vld [vmem:[#allocation7 + $0x38] sm:$0xff]   ;;  %v1840_v33 = vld [vmem:[#allocation2 + $0x4] ss:$8 sps:$4 sm:$0xff]   ;;  %v1870_v44 = vld [vmem:[#allocation10 + $0x34] ss:$12 sps:$4 sm:$0xff]  }
  0x66   :  { %1779 = vmatpush1.bf16.msra.mxu1 %v1806_v6  ;;  %325 = vmatpush1.bf16.msra.mxu0 %v1806_v6  ;;  %v1835_v31 = vld [vmem:[#allocation8 + $0xb0] ss:$12 sps:$4 sm:$0xff]   ;;  %v1862_v34 = vld [vmem:[#allocation10] ss:$12 sps:$4 sm:$0xff]   ;;  %v1865_v41 = vld [vmem:[#allocation10 + $0x18] ss:$12 sps:$4 sm:$0xff]  }
  0x67   :  { %1772 = vmatprep.subr.bf16.mxu1 %v1807_v7  ;;  %326 = vmatprep.subr.bf16.mxu0 %v1807_v7  ;;  %v1837_v32 = vld [vmem:[#allocation7 + $0x18] sm:$0xff]   ;;  %v1864_v35 = vld [vmem:[#allocation10 + $0x4] ss:$12 sps:$4 sm:$0xff]   ;;  %v1872_v55 = vld [vmem:[#allocation10 + $0x48] ss:$12 sps:$4 sm:$0xff]  }
  0x68   :  { %v1867_v36 = vld [vmem:[#allocation10 + $0x1c] ss:$12 sps:$4 sm:$0xff]   ;;  %v1874_v50 = vld [vmem:[#allocation10 + $0x4c] ss:$12 sps:$4 sm:$0xff]   ;;  %v1878_v58 = vld [vmem:[#allocation10 + $0x64] ss:$12 sps:$4 sm:$0xff]  }
  0x69   :  { %v1868_v49 = vld [vmem:[#allocation10 + $0x30] ss:$12 sps:$4 sm:$0xff]   ;;  %v1876_v63 = vld [vmem:[#allocation10 + $0x60] ss:$12 sps:$4 sm:$0xff]  }
  0x6a   :  { %1780 = vmatpush1.bf16.msra.mxu1 %v1809_v8  ;;  %327 = vmatpush1.bf16.msra.mxu0 %v1809_v8 }
  0x6b   :  { %1773 = vmatprep.subr.bf16.mxu1 %v1810_v9  ;;  %328 = vmatprep.subr.bf16.mxu0 %v1810_v9 }
  0x6e   :  { %1781 = vmatpush1.bf16.msra.mxu1 %v1812_v10  ;;  %329 = vmatpush1.bf16.msra.mxu0 %v1812_v10 }
  0x6f   :  { %1774 = vmatprep.subr.bf16.mxu1 %v1813_v11  ;;  %330 = vmatprep.subr.bf16.mxu0 %v1813_v11 }
  0x72   :  { %1782 = vmatpush1.bf16.msra.mxu1 %v1815_v12  ;;  %331 = vmatpush1.bf16.msra.mxu0 %v1815_v12 }
  0x73   :  { %1775 = vmatprep.subr.bf16.mxu1 %v1816_v13  ;;  %332 = vmatprep.subr.bf16.mxu0 %v1816_v13 }
  0x76   :  { %1783 = vmatpush1.bf16.msra.mxu1 %v1818_v14  ;;  %333 = vmatpush1.bf16.msra.mxu0 %v1818_v14 }
  0x77   :  { %1776 = vmatprep.subr.bf16.mxu1 %v1819_v15  ;;  %334 = vmatprep.subr.bf16.mxu0 %v1819_v15 }
  0x7a   :  { %1784 = vmatpush1.bf16.msra.mxu1 %v1821_v16  ;;  %335 = vmatpush1.bf16.msra.mxu0 %v1821_v16 }
  0x7b   :  { %1705 = vmatprep.subr.bf16.mxu1 %v1823_v17  ;;  %962 = vmatprep.subr.bf16.mxu0 %v1864_v35 }
  0x7d   :  { %393 = vmatmul.mubr.bf16.vlgmr.msra.gmra.mrb[0].mxu1 %v1822_v18  ;;  %353 = vmatmul.mubr.bf16.vlgmr.msra.gmra.mrb[0].mxu0 %v1830_v19 }
  0x7e   :  { %1706 = vmatpush3.bf16.msra.mxu1 %v1823_v17  ;;  %402 = vmatprep.mubr.bf16.mxu1 %v2069_v0 }
  0x7f   :  { %1707 = vmatprep.subr.bf16.mxu1 %v1824_v20  ;;  %362 = vmatprep.mubr.bf16.mxu0 %v2069_v0 }
  0x80   :  { %963 = vmatpush1.bf16.msra.mxu0 %v1862_v34 }
  0x81   :  { %964 = vmatprep.subr.bf16.mxu0 %v1867_v36 }
  0x82   :  { %1708 = vmatpush3.bf16.msra.mxu1 %v1824_v20 }
  0x83   :  { %1709 = vmatprep.subr.bf16.mxu1 %v1826_v21 }
  0x84   :  { %965 = vmatpush1.bf16.msra.mxu0 %v1865_v41 }
  0x85   :  { %403 = vmatmul.mubr.bf16.gmra.mrb[4].mxu1 %v1825_v22  ;;  %363 = vmatmul.mubr.bf16.gmra.mrb[4].mxu0 %v1834_v23 }
  0x86   :  { %1710 = vmatpush3.bf16.msra.mxu1 %v1826_v21  ;;  %412 = vmatprep.mubr.bf16.mxu1 %v2069_v0 }
  0x87   :  { %1711 = vmatprep.subr.bf16.mxu1 %v1827_v24  ;;  %372 = vmatprep.mubr.bf16.mxu0 %v2069_v0 }
  0x88   :  { %966 = vmatprep.subr.bf16.mxu0 %v1870_v44 }
  0x89   :  { %967 = vmatpush1.bf16.msra.mxu0 %v1868_v49 }
  0x8a   :  { %1712 = vmatpush3.bf16.msra.mxu1 %v1827_v24  ;;  %968 = vmatprep.subr.bf16.mxu0 %v1874_v50 }
  0x8b   :  { %1713 = vmatprep.subr.bf16.mxu1 %v1829_v25 }
  0x8d   :  { %413 = vmatmul.mubr.bf16.gmra.mrb[8].mxu1 %v1828_v26  ;;  %373 = vmatmul.mubr.bf16.gmra.mrb[8].mxu0 %v1836_v27 }
  0x8e   :  { %1714 = vmatpush3.bf16.msra.mxu1 %v1829_v25  ;;  %422 = vmatprep.mubr.bf16.mxu1 %v2069_v0 }
  0x8f   :  { %1715 = vmatprep.subr.bf16.mxu1 %v1831_v28  ;;  %382 = vmatprep.mubr.bf16.mxu0 %v2069_v0 }
  0x90   :  { %969 = vmatpush1.bf16.msra.mxu0 %v1872_v55  ;;  %v1838_v55 = vld [vmem:[#allocation2] ss:$8 sps:$4 sm:$0xff]  }
  0x91   :  { %970 = vmatprep.subr.bf16.mxu0 %v1878_v58  ;;  %v1841_v58 = vld [vmem:[#allocation2 + $0x14] ss:$8 sps:$4 sm:$0xff]  }
  0x92   :  { %1716 = vmatpush3.bf16.msra.mxu1 %v1831_v28 }
  0x93   :  { %1717 = vmatprep.subr.bf16.mxu1 %v1833_v29 }
  0x94   :  { %971 = vmatpush1.bf16.msra.mxu0 %v1876_v63  ;;  %v1850_v63 = vld [vmem:[#allocation2 + $0x44] ss:$8 sps:$4 sm:$0xff]  }
  0x95   :  { %423 = vmatmul.mubr.bf16.gmra.mrb[12].mxu1 %v1832_v30  ;;  %383 = vmatmul.mubr.bf16.gmra.mrb[12].mxu0 %v1837_v32 }
  0x96   :  { %1718 = vmatpush3.bf16.msra.mxu1 %v1833_v29  ;;  %1721 = vmatprep.mubr.bf16.mxu1 %v1830_v19 }
  0x97   :  { %1719 = vmatprep.subr.bf16.mxu1 %v1835_v31  ;;  %994 = vmatprep.mubr.bf16.mxu0 %v2069_v0 }
  0x9a   :  { %1720 = vmatpush3.bf16.msra.mxu1 %v1835_v31 }
  0x9d   :  { %1722 = vmatmul.mubr.bf16.vlgmr.msra.gmra.mrb[16].mxu1 %v1834_v23 }
  0x9e   :  { %1725 = vmatprep.mubr.bf16.mxu1 %v1836_v27 }
  0xa5   :  { %1726 = vmatmul.mubr.bf16.gmra.mrb[20].mxu1 %v1837_v32 }
  0xa6   :  { %1729 = vmatprep.mubr.bf16.mxu1 %v1822_v18 }
  0xad   :  { %1730 = vmatmul.mubr.bf16.gmra.mrb[24].mxu1 %v1825_v22 }
  0xae   :  { %1733 = vmatprep.mubr.bf16.mxu1 %v1828_v26 }
  0xb5   :  { %1734 = vmatmul.mubr.bf16.gmra.mrb[28].mxu1 %v1832_v30 }
  0xb6   :  { %697 = vmatprep.mubr.bf16.mxu1 %v1840_v33 }
 0x150   :  { %v2206_v37 = vpop.f32.mrb[0].mxu1  ;;  %v2208_v38 = vpop.f32.mrb[0].mxu0 }
 0x151   :  { %v2210_v39 = vpop.f32.mrb[1].mxu1  ;;  %v356_v40 = vpop.f32.mrb[1].mxu0 }
 0x152   :  { %v2212_v42 = vpop.f32.mrb[2].mxu1  ;;  %v2214_v43 = vpop.f32.mrb[2].mxu0 }
 0x153   :  { %v2216_v45 = vpop.f32.mrb[3].mxu1  ;;  %v360_v46 = vpop.f32.mrb[3].mxu0 }
 0x154   :  { %v557_v47 = vpack.c.bf16 %v2216_v45, %v2210_v39  ;;  %v553_v48 = vpack.c.bf16 %v360_v46, %v356_v40  ;;  %v1879_v39 = vld [vmem:[#allocation10 + $0x38] ss:$12 sps:$4 sm:$0xff]  }
 0x155   :  { %v1843_v45 = vld [vmem:[#allocation2 + $0x10] ss:$8 sps:$4 sm:$0xff]  }
 0x158   :  { %v2220_v51 = vpop.f32.mrb[4].mxu1  ;;  %v2222_v52 = vpop.f32.mrb[4].mxu0 }
 0x159   :  { %v2224_v53 = vpop.f32.mrb[5].mxu1  ;;  %v366_v54 = vpop.f32.mrb[5].mxu0 }
 0x15a   :  { %v2226_v56 = vpop.f32.mrb[6].mxu1  ;;  %v2228_v57 = vpop.f32.mrb[6].mxu0 }
 0x15b   :  { %v410_v59 = vpop.f32.mrb[7].mxu1  ;;  %v370_v60 = vpop.f32.mrb[7].mxu0 }
 0x15c   :  { %v558_v61 = vpack.c.bf16 %v410_v59, %v2224_v53  ;;  %v554_v62 = vpack.c.bf16 %v370_v60, %v366_v54  ;;  %v1871_v54 = vld [vmem:[#allocation10 + $0x8] ss:$12 sps:$4 sm:$0xff]   ;;  %v1875_v59 = vld [vmem:[#allocation10 + $0x20] ss:$12 sps:$4 sm:$0xff]  }
 0x15d   :  { %v1846_v60 = vld [vmem:[#allocation2 + $0x20] ss:$8 sps:$4 sm:$0xff]  }
 0x160   :  { %v2231_v1 = vpop.f32.mrb[8].mxu1  ;;  %v2233_v2 = vpop.f32.mrb[8].mxu0 }
 0x161   :  { %v416_v3 = vpop.f32.mrb[9].mxu1  ;;  %v376_v4 = vpop.f32.mrb[9].mxu0 }
 0x162   :  { %v2235_v5 = vpop.f32.mrb[10].mxu1  ;;  %v2237_v6 = vpop.f32.mrb[10].mxu0 }
 0x163   :  { %v420_v7 = vpop.f32.mrb[11].mxu1  ;;  %v380_v8 = vpop.f32.mrb[11].mxu0 }
 0x164   :  { %v559_v9 = vpack.c.bf16 %v420_v7, %v416_v3  ;;  %v555_v10 = vpack.c.bf16 %v380_v8, %v376_v4  ;;  %v1852_v3 = vld [vmem:[#allocation2 + $0x40] ss:$8 sps:$4 sm:$0xff]   ;;  %v1853_v4 = vld [vmem:[#allocation2 + $0x54] ss:$8 sps:$4 sm:$0xff]   ;;  %v1855_v7 = vld [vmem:[#allocation2 + $0x50] ss:$8 sps:$4 sm:$0xff]  }
 0x165   :  { %v1856_v8 = vld [vmem:[#allocation2 + $0x64] ss:$8 sps:$4 sm:$0xff]  }
 0x168   :  { %v2239_v11 = vpop.f32.mrb[12].mxu1  ;;  %v2241_v12 = vpop.f32.mrb[12].mxu0 }
 0x169   :  { %v426_v13 = vpop.f32.mrb[13].mxu1  ;;  %v386_v14 = vpop.f32.mrb[13].mxu0 }
 0x16a   :  { %v2243_v15 = vpop.f32.mrb[14].mxu1  ;;  %v2245_v16 = vpop.f32.mrb[14].mxu0 }
 0x16b   :  { %v430_v17 = vpop.f32.mrb[15].mxu1  ;;  %v390_v18 = vpop.f32.mrb[15].mxu0 }
 0x16c   :  { %v560_v19 = vpack.c.bf16 %v430_v17, %v426_v13  ;;  %v556_v20 = vpack.c.bf16 %v390_v18, %v386_v14  ;;  %v1861_v13 = vld [vmem:[#allocation2 + $0x70] ss:$8 sps:$4 sm:$0xff]   ;;  %v1882_v14 = vld [vmem:[#allocation10 + $0x7c] ss:$12 sps:$4 sm:$0xff]  }
 0x16d   :  { %v1883_v17 = vld [vmem:[#allocation10 + $0x50] ss:$12 sps:$4 sm:$0xff]   ;;  %v1880_v18 = vld [vmem:[#allocation10 + $0x78] ss:$12 sps:$4 sm:$0xff]   ;;  %972 = vmatprep.subr.bf16.mxu0 %v1882_v14 }
 0x16e   :  { %973 = vmatpush1.bf16.msra.mxu0 %v1880_v18 }
 0x170   :  { %v1723_v21 = vpop.f32.mrb[16].mxu1 }
 0x171   :  { %v467_v22 = vpop.f32.mrb[17].mxu1 }
 0x172   :  { %v1724_v23 = vpop.f32.mrb[18].mxu1 }
 0x173   :  { %v562_v24 = vpack.c.bf16 %v1724_v23, %v1723_v21  ;;  %v470_v25 = vpop.f32.mrb[19].mxu1  ;;  %v1884_v21 = vld [vmem:[#allocation10 + $0x90] ss:$12 sps:$4 sm:$0xff]   ;;  %v1891_v23 = vld [vmem:[#allocation10 + $0x80] ss:$12 sps:$4 sm:$0xff]  }
 0x174   :  { %v561_v26 = vpack.c.bf16 %v470_v25, %v467_v22  ;;  %v1890_v22 = vld [vmem:[#allocation10 + $0xac] ss:$12 sps:$4 sm:$0xff]  }
 0x175   :  { %v1892_v25 = vld [vmem:[#allocation10 + $0x98] ss:$12 sps:$4 sm:$0xff]  }
 0x176   :  { %1561 = vmatprep.subr.bf16.mxu1 %v561_v26  ;;  %v1893_v26 = vld [vmem:[#allocation10 + $0xb0] ss:$12 sps:$4 sm:$0xff]  }
 0x177   :  { %1562 = vmatpush3.bf16.msra.mxu1 %v553_v48 }
 0x178   :  { %v1727_v27 = vpop.f32.mrb[20].mxu1  ;;  %1563 = vmatprep.subr.bf16.mxu1 %v562_v24  ;;  %v1888_v24 = vld [vmem:[#allocation10 + $0xa8] ss:$12 sps:$4 sm:$0xff]  }
 0x179   :  { %v483_v28 = vpop.f32.mrb[21].mxu1 }
 0x17a   :  { %v1728_v29 = vpop.f32.mrb[22].mxu1 }
 0x17b   :  { %v564_v30 = vpack.c.bf16 %v1728_v29, %v1727_v27  ;;  %v486_v31 = vpop.f32.mrb[23].mxu1  ;;  %1564 = vmatpush3.bf16.msra.mxu1 %v554_v62  ;;  %v1849_v62 = vld [vmem:[#allocation2 + $0x30] ss:$8 sps:$4 sm:$0xff]  }
 0x17c   :  { %v563_v32 = vpack.c.bf16 %v486_v31, %v483_v28  ;;  %v2253_v28 = vld [vmem:[%s2382_s4] ss:$0 sm:$0xff] }
 0x17e   :  { %1565 = vmatprep.subr.bf16.mxu1 %v563_v32 }
 0x17f   :  { %1566 = vmatpush3.bf16.msra.mxu1 %v555_v10  ;;  %v1859_v10 = vld [vmem:[#allocation2 + $0x74] ss:$8 sps:$4 sm:$0xff]  }
 0x180   :  { %v1731_v33 = vpop.f32.mrb[24].mxu1  ;;  %1567 = vmatprep.subr.bf16.mxu1 %v564_v30  ;;  %v537_v30 = vadd.f32 %v2253_v28, %v2208_v38 }
 0x181   :  { %v499_v34 = vpop.f32.mrb[25].mxu1 }
 0x182   :  { %v1732_v35 = vpop.f32.mrb[26].mxu1 }
 0x183   :  { %v566_v36 = vpack.c.bf16 %v1732_v35, %v1731_v33  ;;  %v502_v40 = vpop.f32.mrb[27].mxu1  ;;  %1568 = vmatpush3.bf16.msra.mxu1 %v556_v20  ;;  %v1887_v20 = vld [vmem:[#allocation10 + $0x68] ss:$12 sps:$4 sm:$0xff]  }
 0x184   :  { %v565_v41 = vpack.c.bf16 %v502_v40, %v499_v34  ;;  %v538_v34 = vadd.f32 %v2253_v28, %v2214_v43 }
 0x186   :  { %1569 = vmatprep.subr.bf16.mxu1 %v565_v41 }
 0x187   :  { %1570 = vmatpush3.bf16.msra.mxu1 %v557_v47  ;;  %v1844_v47 = vld [vmem:[#allocation2 + $0x24] ss:$8 sps:$4 sm:$0xff]  }
 0x188   :  { %v1735_v44 = vpop.f32.mrb[28].mxu1  ;;  %1571 = vmatprep.subr.bf16.mxu1 %v566_v36 }
 0x189   :  { %v515_v46 = vpop.f32.mrb[29].mxu1 }
 0x18a   :  { %v1736_v48 = vpop.f32.mrb[30].mxu1 }
 0x18b   :  { %v568_v49 = vpack.c.bf16 %v1736_v48, %v1735_v44  ;;  %v518_v50 = vpop.f32.mrb[31].mxu1  ;;  %1572 = vmatpush3.bf16.msra.mxu1 %v558_v61  ;;  %v1847_v61 = vld [vmem:[#allocation2 + $0x34] ss:$8 sps:$4 sm:$0xff]  }
 0x18c   :  { %v567_v53 = vpack.c.bf16 %v518_v50, %v515_v46 }
 0x18e   :  { %1573 = vmatprep.subr.bf16.mxu1 %v567_v53 }
 0x18f   :  { %1574 = vmatpush3.bf16.msra.mxu1 %v559_v9  ;;  %v1858_v9 = vld [vmem:[#allocation2 + $0x60] ss:$8 sps:$4 sm:$0xff]  }
 0x190   :  { %1575 = vmatprep.subr.bf16.mxu1 %v568_v49  ;;  %v539_v49 = vadd.f32 %v2253_v28, %v2222_v52  ;;  %v541_v52 = vadd.f32 %v2253_v28, %v2233_v2  ;;  %v543_v2 = vadd.f32 %v2253_v28, %v2241_v12  ;;  %v545_v12 = vadd.f32 %v2253_v28, %v2206_v37 }
 0x191   :  { %v547_v37 = vadd.f32 %v2253_v28, %v2220_v51  ;;  %v549_v51 = vadd.f32 %v2253_v28, %v2231_v1  ;;  %v551_v1 = vadd.f32 %v2253_v28, %v2239_v11  ;;  %v1896_v11 = vld [vmem:[#allocation5 + $0x4] ss:$8 sps:$4 sm:$0xff]  }
 0x193   :  { %1576 = vmatpush3.bf16.msra.mxu1 %v560_v19  ;;  %v1886_v19 = vld [vmem:[#allocation10 + $0x94] ss:$12 sps:$4 sm:$0xff]  }
 0x194   :  { %1737 = vmatprep.subr.bf16.mxu1 %v1871_v54  ;;  %974 = vmatprep.subr.bf16.mxu0 %v1886_v19 }
 0x195   :  { %975 = vmatpush1.bf16.msra.mxu0 %v1884_v21 }
 0x196   :  { %698 = vmatmul.mubr.bf16.vlgmr.msra.gmra.mrb[32].mxu1 %v1838_v55  ;;  %976 = vmatprep.subr.bf16.mxu0 %v1890_v22  ;;  %v540_v55 = vadd.f32 %v2253_v28, %v2228_v57  ;;  %v542_v57 = vadd.f32 %v2253_v28, %v2237_v6  ;;  %v544_v6 = vadd.f32 %v2253_v28, %v2245_v16 }
 0x197   :  { %705 = vmatprep.mubr.bf16.mxu1 %v1841_v58  ;;  %1738 = vmatpush3.bf16.msra.mxu1 %v1871_v54  ;;  %v546_v16 = vadd.f32 %v2253_v28, %v2212_v42  ;;  %v548_v42 = vadd.f32 %v2253_v28, %v2226_v56  ;;  %v550_v56 = vadd.f32 %v2253_v28, %v2235_v5 }
 0x198   :  { %1739 = vmatprep.subr.bf16.mxu1 %v1875_v59  ;;  %v552_v5 = vadd.f32 %v2253_v28, %v2243_v15 }
 0x199   :  { %977 = vmatpush1.bf16.msra.mxu0 %v1888_v24 }
 0x19b   :  { %1740 = vmatpush3.bf16.msra.mxu1 %v1875_v59 }
 0x19c   :  { %1741 = vmatprep.subr.bf16.mxu1 %v1879_v39 }
 0x19e   :  { %706 = vmatmul.mubr.bf16.gmra.mrb[36].mxu1 %v1843_v45 }
 0x19f   :  { %713 = vmatprep.mubr.bf16.mxu1 %v1844_v47  ;;  %1742 = vmatpush3.bf16.msra.mxu1 %v1879_v39 }
 0x1a0   :  { %1743 = vmatprep.subr.bf16.mxu1 %v1883_v17 }
 0x1a3   :  { %1744 = vmatpush3.bf16.msra.mxu1 %v1883_v17 }
 0x1a4   :  { %1745 = vmatprep.subr.bf16.mxu1 %v1887_v20 }
 0x1a6   :  { %714 = vmatmul.mubr.bf16.gmra.mrb[40].mxu1 %v1846_v60 }
 0x1a7   :  { %721 = vmatprep.mubr.bf16.mxu1 %v1847_v61  ;;  %1746 = vmatpush3.bf16.msra.mxu1 %v1887_v20 }
 0x1a8   :  { %1747 = vmatprep.subr.bf16.mxu1 %v1891_v23 }
 0x1ab   :  { %1748 = vmatpush3.bf16.msra.mxu1 %v1891_v23 }
 0x1ac   :  { %1749 = vmatprep.subr.bf16.mxu1 %v1892_v25 }
 0x1ae   :  { %722 = vmatmul.mubr.bf16.gmra.mrb[44].mxu1 %v1849_v62 }
 0x1af   :  { %729 = vmatprep.mubr.bf16.mxu1 %v1850_v63  ;;  %1750 = vmatpush3.bf16.msra.mxu1 %v1892_v25 }
 0x1b0   :  { %1751 = vmatprep.subr.bf16.mxu1 %v1893_v26 }
 0x1b3   :  { %1752 = vmatpush3.bf16.msra.mxu1 %v1893_v26 }
 0x1b6   :  { %730 = vmatmul.mubr.bf16.gmra.mrb[48].mxu1 %v1852_v3 }
 0x1b7   :  { %737 = vmatprep.mubr.bf16.mxu1 %v1853_v4 }
 0x1be   :  { %738 = vmatmul.mubr.bf16.gmra.mrb[52].mxu1 %v1855_v7 }
 0x1bf   :  { %745 = vmatprep.mubr.bf16.mxu1 %v1856_v8 }
 0x1c6   :  { %746 = vmatmul.mubr.bf16.gmra.mrb[56].mxu1 %v1858_v9 }
 0x1c7   :  { %753 = vmatprep.mubr.bf16.mxu1 %v1859_v10 }
 0x1ce   :  { %754 = vmatmul.mubr.bf16.gmra.mrb[60].mxu1 %v1861_v13 }
 0x269   :  { %v1577_v27 = vpop.f32.mrb[32].mxu1 }
 0x26a   :  { %v1578_v29 = vpop.f32.mrb[33].mxu1 }
 0x26b   :  { %v1579_v31 = vadd.f32 %v1578_v29, %v1577_v27  ;;  %v1580_v32 = vpop.f32.mrb[34].mxu1 }
 0x26c   :  { %v1581_v33 = vpop.f32.mrb[35].mxu1 }
 0x26d   :  { %v762_v35 = vadd.f32 %v1579_v31, %v537_v30  ;;  %v1582_v36 = vadd.f32 %v1581_v33, %v1580_v32 }
 0x26f   :  { %v763_v40 = vadd.f32 %v1582_v36, %v538_v34  ;;  %v778_v41 = vmax.f32 %v762_v35, 0.0 }
 0x271   :  { %v779_v44 = vmax.f32 %v763_v40, 0.0  ;;  %v1583_v46 = vpop.f32.mrb[36].mxu1 }
 0x272   :  { %v1584_v48 = vpop.f32.mrb[37].mxu1 }
 0x273   :  { %v794_v50 = vpack.c.bf16 %v779_v44, %v778_v41  ;;  %v1585_v53 = vadd.f32 %v1584_v48, %v1583_v46  ;;  %v1586_v54 = vpop.f32.mrb[38].mxu1 }
 0x274   :  { %v1587_v38 = vpop.f32.mrb[39].mxu1 }
 0x275   :  { %v764_v58 = vadd.f32 %v1585_v53, %v539_v49  ;;  %v1588_v59 = vadd.f32 %v1587_v38, %v1586_v54  ;;  %995 = vmatmul.mubr.bf16.vlgmr.msra.gmra.mrb[16].mxu0 %v794_v50  ;;  %1753 = vmatprep.mubr.bf16.mxu1 %v794_v50 }
 0x276   :  { %1004 = vmatprep.mubr.bf16.mxu0 %v2069_v0 }
 0x277   :  { %v765_v43 = vadd.f32 %v1588_v59, %v540_v55  ;;  %v780_v39 = vmax.f32 %v764_v58, 0.0 }
 0x279   :  { %v781_v45 = vmax.f32 %v765_v43, 0.0  ;;  %v1589_v47 = vpop.f32.mrb[40].mxu1 }
 0x27a   :  { %v1590_v60 = vpop.f32.mrb[41].mxu1 }
 0x27b   :  { %v1591_v61 = vadd.f32 %v1590_v60, %v1589_v47  ;;  %v1592_v62 = vpop.f32.mrb[42].mxu1  ;;  %v795_v63 = vpack.c.bf16 %v781_v45, %v780_v39 }
 0x27c   :  { %v1593_v3 = vpop.f32.mrb[43].mxu1 }
 0x27d   :  { %v766_v4 = vadd.f32 %v1591_v61, %v541_v52  ;;  %v1594_v7 = vadd.f32 %v1593_v3, %v1592_v62  ;;  %1005 = vmatmul.mubr.bf16.gmra.mrb[20].mxu0 %v795_v63  ;;  %1754 = vmatmul.mubr.bf16.vlgmr.msra.gmra.mrb[64].mxu1 %v795_v63 }
 0x27e   :  { %1014 = vmatprep.mubr.bf16.mxu0 %v2069_v0 }
 0x27f   :  { %v767_v8 = vadd.f32 %v1594_v7, %v542_v57  ;;  %v782_v9 = vmax.f32 %v766_v4, 0.0 }
 0x281   :  { %v783_v10 = vmax.f32 %v767_v8, 0.0  ;;  %v1595_v13 = vpop.f32.mrb[44].mxu1 }
 0x282   :  { %v1596_v14 = vpop.f32.mrb[45].mxu1 }
 0x283   :  { %v1597_v17 = vadd.f32 %v1596_v14, %v1595_v13  ;;  %v1598_v18 = vpop.f32.mrb[46].mxu1  ;;  %v796_v19 = vpack.c.bf16 %v783_v10, %v782_v9 }
 0x284   :  { %v1599_v20 = vpop.f32.mrb[47].mxu1 }
 0x285   :  { %v768_v21 = vadd.f32 %v1597_v17, %v543_v2  ;;  %v1600_v22 = vadd.f32 %v1599_v20, %v1598_v18  ;;  %1015 = vmatmul.mubr.bf16.gmra.mrb[24].mxu0 %v796_v19  ;;  %1757 = vmatprep.mubr.bf16.mxu1 %v796_v19 }
 0x286   :  { %1024 = vmatprep.mubr.bf16.mxu0 %v2069_v0 }
 0x287   :  { %v769_v23 = vadd.f32 %v1600_v22, %v544_v6  ;;  %v784_v24 = vmax.f32 %v768_v21, 0.0 }
 0x289   :  { %v785_v25 = vmax.f32 %v769_v23, 0.0  ;;  %v1601_v26 = vpop.f32.mrb[48].mxu1 }
 0x28a   :  { %v1602_v27 = vpop.f32.mrb[49].mxu1 }
 0x28b   :  { %v1603_v29 = vadd.f32 %v1602_v27, %v1601_v26  ;;  %v1604_v30 = vpop.f32.mrb[50].mxu1  ;;  %v797_v31 = vpack.c.bf16 %v785_v25, %v784_v24 }
 0x28c   :  { %v1605_v32 = vpop.f32.mrb[51].mxu1 }
 0x28d   :  { %v770_v33 = vadd.f32 %v1603_v29, %v545_v12  ;;  %v1606_v34 = vadd.f32 %v1605_v32, %v1604_v30  ;;  %1025 = vmatmul.mubr.bf16.gmra.mrb[28].mxu0 %v797_v31  ;;  %1758 = vmatmul.mubr.bf16.gmra.mrb[68].mxu1 %v797_v31 }
 0x28e   :  { %1034 = vmatprep.mubr.bf16.mxu0 %v2069_v0 }
 0x28f   :  { %v771_v35 = vadd.f32 %v1606_v34, %v546_v16  ;;  %v786_v36 = vmax.f32 %v770_v33, 0.0 }
 0x291   :  { %v787_v40 = vmax.f32 %v771_v35, 0.0  ;;  %v1607_v41 = vpop.f32.mrb[52].mxu1 }
 0x292   :  { %v1608_v44 = vpop.f32.mrb[53].mxu1 }
 0x293   :  { %v1609_v46 = vadd.f32 %v1608_v44, %v1607_v41  ;;  %v1610_v48 = vpop.f32.mrb[54].mxu1  ;;  %v798_v49 = vpack.c.bf16 %v787_v40, %v786_v36 }
 0x294   :  { %v1611_v50 = vpop.f32.mrb[55].mxu1 }
 0x295   :  { %v772_v53 = vadd.f32 %v1609_v46, %v547_v37  ;;  %v1612_v54 = vadd.f32 %v1611_v50, %v1610_v48  ;;  %1035 = vmatmul.mubr.bf16.gmra.mrb[32].mxu0 %v798_v49  ;;  %1761 = vmatprep.mubr.bf16.mxu1 %v798_v49 }
 0x296   :  { %1044 = vmatprep.mubr.bf16.mxu0 %v2069_v0 }
 0x297   :  { %v773_v38 = vadd.f32 %v1612_v54, %v548_v42  ;;  %v788_v55 = vmax.f32 %v772_v53, 0.0 }
 0x299   :  { %v789_v58 = vmax.f32 %v773_v38, 0.0  ;;  %v1613_v59 = vpop.f32.mrb[56].mxu1 }
 0x29a   :  { %v1614_v43 = vpop.f32.mrb[57].mxu1 }
 0x29b   :  { %v1615_v39 = vadd.f32 %v1614_v43, %v1613_v59  ;;  %v1616_v45 = vpop.f32.mrb[58].mxu1  ;;  %v799_v47 = vpack.c.bf16 %v789_v58, %v788_v55 }
 0x29c   :  { %v1617_v60 = vpop.f32.mrb[59].mxu1 }
 0x29d   :  { %v774_v52 = vadd.f32 %v1615_v39, %v549_v51  ;;  %v1618_v61 = vadd.f32 %v1617_v60, %v1616_v45  ;;  %1045 = vmatmul.mubr.bf16.gmra.mrb[36].mxu0 %v799_v47  ;;  %1762 = vmatmul.mubr.bf16.gmra.mrb[72].mxu1 %v799_v47 }
 0x29e   :  { %1054 = vmatprep.mubr.bf16.mxu0 %v2069_v0 }
 0x29f   :  { %v775_v62 = vadd.f32 %v1618_v61, %v550_v56  ;;  %v790_v63 = vmax.f32 %v774_v52, 0.0 }
 0x2a1   :  { %v791_v3 = vmax.f32 %v775_v62, 0.0  ;;  %v1619_v57 = vpop.f32.mrb[60].mxu1 }
 0x2a2   :  { %v1620_v4 = vpop.f32.mrb[61].mxu1 }
 0x2a3   :  { %v1621_v7 = vadd.f32 %v1620_v4, %v1619_v57  ;;  %v1622_v8 = vpop.f32.mrb[62].mxu1  ;;  %v800_v9 = vpack.c.bf16 %v791_v3, %v790_v63 }
 0x2a4   :  { %v1623_v10 = vpop.f32.mrb[63].mxu1 }
 0x2a5   :  { %v776_v13 = vadd.f32 %v1621_v7, %v551_v1  ;;  %v1624_v14 = vadd.f32 %v1623_v10, %v1622_v8  ;;  %1055 = vmatmul.mubr.bf16.gmra.mrb[40].mxu0 %v800_v9  ;;  %1765 = vmatprep.mubr.bf16.mxu1 %v800_v9 }
 0x2a6   :  { %1064 = vmatprep.mubr.bf16.mxu0 %v2069_v0 }
 0x2a7   :  { %v777_v2 = vadd.f32 %v1624_v14, %v552_v5  ;;  %v792_v17 = vmax.f32 %v776_v13, 0.0 }
 0x2a9   :  { %v793_v18 = vmax.f32 %v777_v2, 0.0 }
 0x2ab   :  { %v801_v19 = vpack.c.bf16 %v793_v18, %v792_v17 }
 0x2ad   :  { %1065 = vmatmul.mubr.bf16.gmra.mrb[44].mxu0 %v801_v19  ;;  %1766 = vmatmul.mubr.bf16.gmra.mrb[76].mxu1 %v801_v19 }
 0x2ae   :  { %1339 = vmatprep.mubr.bf16.mxu0 %v1896_v11 }
 0x348   :  { %v2294_v20 = vpop.f32.mrb[16].mxu0 }
 0x349   :  { %v998_v6 = vpop.f32.mrb[17].mxu0 }
 0x34a   :  { %v2296_v21 = vpop.f32.mrb[18].mxu0 }
 0x34b   :  { %v1002_v15 = vpop.f32.mrb[19].mxu0 }
 0x34c   :  { %v1195_v28 = vpack.c.bf16 %v1002_v15, %v998_v6  ;;  %v1894_v6 = vld [vmem:[#allocation5] ss:$8 sps:$4 sm:$0xff]   ;;  %v1897_v15 = vld [vmem:[#allocation5 + $0x14] ss:$8 sps:$4 sm:$0xff]  }
 0x350   :  { %v2298_v22 = vpop.f32.mrb[20].mxu0  ;;  %v1755_v23 = vpop.f32.mrb[64].mxu1 }
 0x351   :  { %v1008_v24 = vpop.f32.mrb[21].mxu0  ;;  %v1109_v0 = vpop.f32.mrb[65].mxu1 }
 0x352   :  { %v2300_v25 = vpop.f32.mrb[22].mxu0  ;;  %v1756_v26 = vpop.f32.mrb[66].mxu1 }
 0x353   :  { %v1204_v27 = vpack.c.bf16 %v1756_v26, %v1755_v23  ;;  %v1012_v12 = vpop.f32.mrb[23].mxu0  ;;  %v1112_v29 = vpop.f32.mrb[67].mxu1  ;;  %v1900_v23 = vld [vmem:[#allocation5 + $0x24] ss:$8 sps:$4 sm:$0xff]   ;;  %v1905_v26 = vld [vmem:[#allocation5 + $0x30] ss:$8 sps:$4 sm:$0xff]  }
 0x354   :  { %v1196_v30 = vpack.c.bf16 %v1012_v12, %v1008_v24  ;;  %v1203_v31 = vpack.c.bf16 %v1112_v29, %v1109_v0  ;;  %v1902_v24 = vld [vmem:[#allocation5 + $0x20] ss:$8 sps:$4 sm:$0xff]   ;;  %v1903_v0 = vld [vmem:[#allocation5 + $0x34] ss:$8 sps:$4 sm:$0xff]  }
 0x355   :  { %v1908_v12 = vld [vmem:[#allocation5 + $0x40] ss:$8 sps:$4 sm:$0xff]   ;;  %v1909_v29 = vld [vmem:[#allocation5 + $0x54] ss:$8 sps:$4 sm:$0xff]  }
 0x356   :  { %1641 = vmatprep.subr.bf16.mxu0 %v1203_v31  ;;  %v1912_v31 = vld [vmem:[#allocation5 + $0x64] ss:$8 sps:$4 sm:$0xff]  }
 0x357   :  { %1642 = vmatpush3.bf16.msra.mxu0 %v1195_v28  ;;  %v1899_v28 = vld [vmem:[#allocation5 + $0x10] ss:$8 sps:$4 sm:$0xff]  }
 0x358   :  { %v2302_v32 = vpop.f32.mrb[24].mxu0  ;;  %1643 = vmatprep.subr.bf16.mxu0 %v1204_v27  ;;  %v1906_v27 = vld [vmem:[#allocation5 + $0x44] ss:$8 sps:$4 sm:$0xff]  }
 0x359   :  { %v1018_v16 = vpop.f32.mrb[25].mxu0 }
 0x35a   :  { %v2304_v33 = vpop.f32.mrb[26].mxu0 }
 0x35b   :  { %v1022_v34 = vpop.f32.mrb[27].mxu0  ;;  %1644 = vmatpush3.bf16.msra.mxu0 %v1196_v30  ;;  %v1911_v30 = vld [vmem:[#allocation5 + $0x50] ss:$8 sps:$4 sm:$0xff]  }
 0x35c   :  { %v1197_v35 = vpack.c.bf16 %v1022_v34, %v1018_v16  ;;  %v1914_v16 = vld [vmem:[#allocation5 + $0x60] ss:$8 sps:$4 sm:$0xff]   ;;  %v1915_v34 = vld [vmem:[#allocation5 + $0x74] ss:$8 sps:$4 sm:$0xff]  }
 0x360   :  { %v2306_v36 = vpop.f32.mrb[28].mxu0  ;;  %v1759_v40 = vpop.f32.mrb[68].mxu1 }
 0x361   :  { %v1028_v41 = vpop.f32.mrb[29].mxu0  ;;  %v1125_v44 = vpop.f32.mrb[69].mxu1 }
 0x362   :  { %v2308_v37 = vpop.f32.mrb[30].mxu0  ;;  %v1760_v46 = vpop.f32.mrb[70].mxu1 }
 0x363   :  { %v1206_v48 = vpack.c.bf16 %v1760_v46, %v1759_v40  ;;  %v1032_v49 = vpop.f32.mrb[31].mxu0  ;;  %v1128_v50 = vpop.f32.mrb[71].mxu1  ;;  %v2329_v40 = vld [vmem:[%s2384_s6] ss:$0 sm:$0xff]  ;;  %s2070_s6 = smov [#allocation11]  }
 0x364   :  { %v1198_v42 = vpack.c.bf16 %v1032_v49, %v1028_v41  ;;  %v1205_v53 = vpack.c.bf16 %v1128_v50, %v1125_v44  ;;  %v1179_v46 = vadd.f32 %v2329_v40, %v2294_v20  ;;  %v1182_v20 = vadd.f32 %v2329_v40, %v2300_v25  ;;  %s1441_s21 = sshll.u32 %s2070_s6, 4  ;;  %s1442_s21 = int_to_ptr.vmem [resolvable:$true] %s1441_s21 }
 0x365   :  { %s2028_s22 = scalar_lea.vmem %s1442_s21, 2048  ;;  %p2033_p13 = scmp.lt.s32.totalorder %s1442_s21, %s1442_s21 }
 0x366   :  { %1645 = vmatprep.subr.bf16.mxu0 %v1205_v53  ;;  %p2029_p12 = scmp.ne.s32.totalorder %s1442_s21, %s2028_s22  ;;  %p2034_p0 = scmp.lt.s32.totalorder %s2028_s22, %s2028_s22 }
 0x367   :  { %1646 = vmatpush3.bf16.msra.mxu0 %v1197_v35  ;;  %v1917_v35 = vld [vmem:[#allocation5 + $0x70] ss:$8 sps:$4 sm:$0xff]  }
 0x368   :  { %v2310_v54 = vpop.f32.mrb[32].mxu0  ;;  %1647 = vmatprep.subr.bf16.mxu0 %v1206_v48  ;;  %p2035_p1 = por %p2034_p0, %p2033_p13 }
 0x369   :  { %v1038_v38 = vpop.f32.mrb[33].mxu0 }
 0x36a   :  { %v2312_v55 = vpop.f32.mrb[34].mxu0  ;;  %p2036_p2 = pnand %p2035_p1, %p2029_p12 }
 0x36b   :  { %v1042_v58 = vpop.f32.mrb[35].mxu0  ;;  %1648 = vmatpush3.bf16.msra.mxu0 %v1198_v42  ;;  %v1180_v42 = vadd.f32 %v2329_v40, %v2296_v21 }
 0x36c   :  { %v1199_v59 = vpack.c.bf16 %v1042_v58, %v1038_v38 }
 0x370   :  { %v2314_v43 = vpop.f32.mrb[36].mxu0  ;;  %v1763_v51 = vpop.f32.mrb[72].mxu1 }
 0x371   :  { %v1048_v39 = vpop.f32.mrb[37].mxu0  ;;  %v1141_v45 = vpop.f32.mrb[73].mxu1 }
 0x372   :  { %v2316_v47 = vpop.f32.mrb[38].mxu0  ;;  %v1764_v60 = vpop.f32.mrb[74].mxu1 }
 0x373   :  { %v1208_v56 = vpack.c.bf16 %v1764_v60, %v1763_v51  ;;  %v1052_v52 = vpop.f32.mrb[39].mxu0  ;;  %v1144_v61 = vpop.f32.mrb[75].mxu1 }
 0x374   :  { %v1200_v62 = vpack.c.bf16 %v1052_v52, %v1048_v39  ;;  %v1207_v63 = vpack.c.bf16 %v1144_v61, %v1141_v45  ;;  %v1181_v39 = vadd.f32 %v2329_v40, %v2298_v22  ;;  %v1184_v22 = vadd.f32 %v2329_v40, %v2304_v33 }
 0x376   :  { %1649 = vmatprep.subr.bf16.mxu0 %v1207_v63 }
 0x377   :  { %1650 = vmatpush3.bf16.msra.mxu0 %v1199_v59 }
 0x378   :  { %v2318_v3 = vpop.f32.mrb[40].mxu0  ;;  %1651 = vmatprep.subr.bf16.mxu0 %v1208_v56 }
 0x379   :  { %v1058_v57 = vpop.f32.mrb[41].mxu0 }
 0x37a   :  { %v2320_v4 = vpop.f32.mrb[42].mxu0 }
 0x37b   :  { %v1062_v1 = vpop.f32.mrb[43].mxu0  ;;  %1652 = vmatpush3.bf16.msra.mxu0 %v1200_v62 }
 0x37c   :  { %v1201_v7 = vpack.c.bf16 %v1062_v1, %v1058_v57  ;;  %v1183_v57 = vadd.f32 %v2329_v40, %v2302_v32  ;;  %v1186_v32 = vadd.f32 %v2329_v40, %v2308_v37 }
 0x380   :  { %v2322_v8 = vpop.f32.mrb[44].mxu0  ;;  %v1767_v9 = vpop.f32.mrb[76].mxu1 }
 0x381   :  { %v1068_v10 = vpop.f32.mrb[45].mxu0  ;;  %v1157_v5 = vpop.f32.mrb[77].mxu1 }
 0x382   :  { %v2324_v13 = vpop.f32.mrb[46].mxu0  ;;  %v1768_v14 = vpop.f32.mrb[78].mxu1 }
 0x383   :  { %v1210_v2 = vpack.c.bf16 %v1768_v14, %v1767_v9  ;;  %v1072_v17 = vpop.f32.mrb[47].mxu0  ;;  %v1160_v18 = vpop.f32.mrb[79].mxu1 }
 0x384   :  { %v1202_v19 = vpack.c.bf16 %v1072_v17, %v1068_v10  ;;  %v1209_v11 = vpack.c.bf16 %v1160_v18, %v1157_v5  ;;  %v1185_v17 = vadd.f32 %v2329_v40, %v2306_v36  ;;  %v1188_v36 = vadd.f32 %v2329_v40, %v2312_v55 }
 0x386   :  { %1653 = vmatprep.subr.bf16.mxu0 %v1209_v11 }
 0x387   :  { %1654 = vmatpush3.bf16.msra.mxu0 %v1201_v7 }
 0x388   :  { %1655 = vmatprep.subr.bf16.mxu0 %v1210_v2 }
 0x38b   :  { %1656 = vmatpush3.bf16.msra.mxu0 %v1202_v19 }
 0x38e   :  { %1340 = vmatmul.mubr.bf16.vlgmr.msra.gmra.mrb[48].mxu0 %v1894_v6 }
 0x38f   :  { %1347 = vmatprep.mubr.bf16.mxu0 %v1897_v15 }
 0x396   :  { %1348 = vmatmul.mubr.bf16.gmra.mrb[52].mxu0 %v1899_v28 }
 0x397   :  { %1355 = vmatprep.mubr.bf16.mxu0 %v1900_v23 }
 0x39e   :  { %1356 = vmatmul.mubr.bf16.gmra.mrb[56].mxu0 %v1902_v24  ;;  %v1187_v24 = vadd.f32 %v2329_v40, %v2310_v54  ;;  %v1190_v54 = vadd.f32 %v2329_v40, %v2316_v47 }
 0x39f   :  { %1363 = vmatprep.mubr.bf16.mxu0 %v1903_v0 }
 0x3a6   :  { %1364 = vmatmul.mubr.bf16.gmra.mrb[60].mxu0 %v1905_v26 }
 0x3a7   :  { %1371 = vmatprep.mubr.bf16.mxu0 %v1906_v27 }
 0x3ae   :  { %1372 = vmatmul.mubr.bf16.gmra.mrb[64].mxu0 %v1908_v12 }
 0x3af   :  { %1379 = vmatprep.mubr.bf16.mxu0 %v1909_v29 }
 0x3b6   :  { %1380 = vmatmul.mubr.bf16.gmra.mrb[68].mxu0 %v1911_v30 }
 0x3b7   :  { %1387 = vmatprep.mubr.bf16.mxu0 %v1912_v31 }
 0x3be   :  { %1388 = vmatmul.mubr.bf16.gmra.mrb[72].mxu0 %v1914_v16  ;;  %v1189_v16 = vadd.f32 %v2329_v40, %v2314_v43  ;;  %v1192_v43 = vadd.f32 %v2329_v40, %v2320_v4 }
 0x3bf   :  { %1395 = vmatprep.mubr.bf16.mxu0 %v1915_v34 }
 0x3c6   :  { %1396 = vmatmul.mubr.bf16.gmra.mrb[76].mxu0 %v1917_v35 }
 0x461   :  { %v1657_v41 = vpop.f32.mrb[48].mxu0 }
 0x462   :  { %v1658_v44 = vpop.f32.mrb[49].mxu0 }
 0x463   :  { %v1659_v48 = vadd.f32 %v1658_v44, %v1657_v41  ;;  %v1660_v49 = vpop.f32.mrb[50].mxu0 }
 0x464   :  { %v1661_v50 = vpop.f32.mrb[51].mxu0 }
 0x465   :  { %v1404_v53 = vadd.f32 %v1659_v48, %v1179_v46  ;;  %v1662_v38 = vadd.f32 %v1661_v50, %v1660_v49  ;;  %v1191_v50 = vadd.f32 %v2329_v40, %v2318_v3  ;;  %v1194_v3 = vadd.f32 %v2329_v40, %v2324_v13 }
 0x467   :  { %1420 = vst [vmem:[#allocation11] sm:$0xff] %v1404_v53  ;;  %v1405_v58 = vadd.f32 %v1662_v38, %v1180_v42 }
 0x469   :  { %1421 = vst [vmem:[#allocation11 + $0x8] sm:$0xff] %v1405_v58  ;;  %v1663_v59 = vpop.f32.mrb[52].mxu0 }
 0x46a   :  { %v1664_v51 = vpop.f32.mrb[53].mxu0 }
 0x46b   :  { %v1665_v45 = vadd.f32 %v1664_v51, %v1663_v59  ;;  %v1666_v60 = vpop.f32.mrb[54].mxu0 }
 0x46c   :  { %v1667_v56 = vpop.f32.mrb[55].mxu0 }
 0x46d   :  { %v1406_v52 = vadd.f32 %v1665_v45, %v1181_v39  ;;  %v1668_v61 = vadd.f32 %v1667_v56, %v1666_v60  ;;  %v1193_v45 = vadd.f32 %v2329_v40, %v2322_v8 }
 0x46f   :  { %1422 = vst [vmem:[#allocation11 + $0x10] sm:$0xff] %v1406_v52  ;;  %v1407_v21 = vadd.f32 %v1668_v61, %v1182_v20 }
 0x471   :  { %1423 = vst [vmem:[#allocation11 + $0x18] sm:$0xff] %v1407_v21  ;;  %v1669_v62 = vpop.f32.mrb[56].mxu0 }
 0x472   :  { %v1670_v63 = vpop.f32.mrb[57].mxu0 }
 0x473   :  { %v1671_v1 = vadd.f32 %v1670_v63, %v1669_v62  ;;  %v1672_v7 = vpop.f32.mrb[58].mxu0 }
 0x474   :  { %v1673_v9 = vpop.f32.mrb[59].mxu0 }
 0x475   :  { %v1408_v10 = vadd.f32 %v1671_v1, %v1183_v57  ;;  %v1674_v5 = vadd.f32 %v1673_v9, %v1672_v7 }
 0x477   :  { %1424 = vst [vmem:[#allocation11 + $0x20] sm:$0xff] %v1408_v10  ;;  %v1409_v25 = vadd.f32 %v1674_v5, %v1184_v22 }
 0x479   :  { %1425 = vst [vmem:[#allocation11 + $0x28] sm:$0xff] %v1409_v25  ;;  %v1675_v14 = vpop.f32.mrb[60].mxu0 }
 0x47a   :  { %v1676_v2 = vpop.f32.mrb[61].mxu0 }
 0x47b   :  { %v1677_v18 = vadd.f32 %v1676_v2, %v1675_v14  ;;  %v1678_v19 = vpop.f32.mrb[62].mxu0 }
 0x47c   :  { %v1679_v11 = vpop.f32.mrb[63].mxu0 }
 0x47d   :  { %v1410_v6 = vadd.f32 %v1677_v18, %v1185_v17  ;;  %v1680_v15 = vadd.f32 %v1679_v11, %v1678_v19 }
 0x47f   :  { %1426 = vst [vmem:[#allocation11 + $0x30] sm:$0xff] %v1410_v6  ;;  %v1411_v33 = vadd.f32 %v1680_v15, %v1186_v32 }
 0x481   :  { %1427 = vst [vmem:[#allocation11 + $0x38] sm:$0xff] %v1411_v33  ;;  %v1681_v28 = vpop.f32.mrb[64].mxu0 }
 0x482   :  { %v1682_v23 = vpop.f32.mrb[65].mxu0 }
 0x483   :  { %v1683_v0 = vadd.f32 %v1682_v23, %v1681_v28  ;;  %v1684_v26 = vpop.f32.mrb[66].mxu0 }
 0x484   :  { %v1685_v27 = vpop.f32.mrb[67].mxu0 }
 0x485   :  { %v1412_v12 = vadd.f32 %v1683_v0, %v1187_v24  ;;  %v1686_v29 = vadd.f32 %v1685_v27, %v1684_v26 }
 0x487   :  { %1428 = vst [vmem:[#allocation11 + $0x40] sm:$0xff] %v1412_v12  ;;  %v1413_v37 = vadd.f32 %v1686_v29, %v1188_v36 }
 0x489   :  { %1429 = vst [vmem:[#allocation11 + $0x48] sm:$0xff] %v1413_v37  ;;  %v1687_v30 = vpop.f32.mrb[68].mxu0 }
 0x48a   :  { %v1688_v31 = vpop.f32.mrb[69].mxu0 }
 0x48b   :  { %v1689_v34 = vadd.f32 %v1688_v31, %v1687_v30  ;;  %v1690_v35 = vpop.f32.mrb[70].mxu0 }
 0x48c   :  { %v1691_v41 = vpop.f32.mrb[71].mxu0 }
 0x48d   :  { %v1414_v44 = vadd.f32 %v1689_v34, %v1189_v16  ;;  %v1692_v46 = vadd.f32 %v1691_v41, %v1690_v35 }
 0x48f   :  { %1430 = vst [vmem:[#allocation11 + $0x50] sm:$0xff] %v1414_v44  ;;  %v1415_v55 = vadd.f32 %v1692_v46, %v1190_v54 }
 0x491   :  { %1431 = vst [vmem:[#allocation11 + $0x58] sm:$0xff] %v1415_v55  ;;  %v1693_v48 = vpop.f32.mrb[72].mxu0 }
 0x492   :  { %v1694_v49 = vpop.f32.mrb[73].mxu0 }
 0x493   :  { %v1695_v42 = vadd.f32 %v1694_v49, %v1693_v48  ;;  %v1696_v53 = vpop.f32.mrb[74].mxu0 }
 0x494   :  { %v1697_v38 = vpop.f32.mrb[75].mxu0 }
 0x495   :  { %v1416_v58 = vadd.f32 %v1695_v42, %v1191_v50  ;;  %v1698_v59 = vadd.f32 %v1697_v38, %v1696_v53 }
 0x497   :  { %1432 = vst [vmem:[#allocation11 + $0x60] sm:$0xff] %v1416_v58  ;;  %v1417_v47 = vadd.f32 %v1698_v59, %v1192_v43 }
 0x499   :  { %1433 = vst [vmem:[#allocation11 + $0x68] sm:$0xff] %v1417_v47  ;;  %v1699_v51 = vpop.f32.mrb[76].mxu0 }
 0x49a   :  { %v1700_v39 = vpop.f32.mrb[77].mxu0 }
 0x49b   :  { %v1701_v60 = vadd.f32 %v1700_v39, %v1699_v51  ;;  %v1702_v56 = vpop.f32.mrb[78].mxu0 }
 0x49c   :  { %v1703_v20 = vpop.f32.mrb[79].mxu0 }
 0x49d   :  { %v1418_v52 = vadd.f32 %v1701_v60, %v1193_v45  ;;  %v1704_v4 = vadd.f32 %v1703_v20, %v1702_v56 }
 0x49f   :  { %1434 = vst [vmem:[#allocation11 + $0x70] sm:$0xff] %v1418_v52  ;;  %v1419_v61 = vadd.f32 %v1704_v4, %v1194_v3 }
 0x4a1   :  { %1435 = vst [vmem:[#allocation11 + $0x78] sm:$0xff] %v1419_v61 }
 0x4a2   :  { %2039 = shalt.err (!%p2036_p2)
}
 0x4a3   :  { %s2040_s26 = scalar_lea.hbm %s2385_s7, 2048 }
 0x4a4   :  { %p2041_p3 = scmp.ne.s32.totalorder %s2385_s7, %s2040_s26  ;;  %p2044_p4 = scmp.lt.u32.totalorder %s2040_s26, %s2385_s7 }
 0x4a6   :  { %p2046_p5 = pnand %p2044_p4, %p2041_p3 }
 0x4a8   :  { %2049 = shalt.err (!%p2046_p5)
}
 0x4a9   :  { %1447 = dma.vmem_to_hbm [thread:$0]  %s1442_s21, 2048, %s2385_s7, [#allocation4], %s2060_s13, %s2060_s13, %s2061_s14  }
 0x4aa   :  { %2056 = dma.done.wait [#allocation4], 2048  }
 0x4ab   :  { %2057 = vsyncadd [#allocation4], 4294965248 }
 0x4ac   :  { %1451 = vsyncpa [#allocation3], 1 }
 0x4ad   :  { %1452 = vsyncpa [#allocation6], 1 }
 0x4ae   :  { %1453 = vsyncpa [#allocation9], 1 }
 0x4af   :  { %1454 = vsyncpa [#allocation4], 1 }

</bundles_post_ra>
